<compile_context>
chip_gen: v7x
topology: tpu7x:2x2x1
jax: 0.10.0
libtpu: 0.0.40
codegen_flags: <defaults>
</compile_context>

<pallas_src>
import functools

import jax
import jax.numpy as jnp
from jax.experimental import pallas as pl
from jax.experimental.pallas import tpu as pltpu


# ----------------------------- kernel ---------------------------------------


def _mfsp_kernel(x_ref, w1_ref, b1_ref, w2_ref, b2_ref, o_ref, *, mxu_dtype):
    # One batch tile, all V heads fused on the lane axis (lane-padded to 128).
    x = x_ref[...].astype(mxu_dtype)                    # (tm, In)
    w1 = w1_ref[...].astype(mxu_dtype)                  # (In, H_pad)
    h = jnp.tanh(
        jnp.dot(x, w1, preferred_element_type=jnp.float32) + b1_ref[...]
    )                                                   # (tm, H_pad), f32
    w2 = w2_ref[...].astype(mxu_dtype)                  # (H_pad, O_pad)
    y = (
        jnp.dot(h.astype(mxu_dtype), w2, preferred_element_type=jnp.float32)
        + b2_ref[...]
    )                                                   # (tm, O_pad), f32
    o_ref[...] = y.astype(o_ref.dtype)


# --------------------- one-shot parameter layout fusion ---------------------


def fuse_params(w1, b1, w2, b2):
    """Fuse + pad the V per-head parameter sets. Call ONCE at module init
    (or under jit where it constant-folds), not per forward call."""
    V, In, S = w1.shape
    Out = w2.shape[-1]
    H, O = V * S, V * Out
    H_pad = pl.cdiv(H, 128) * 128
    O_pad = pl.cdiv(O, 128) * 128

    # Layer 1: concat the V heads along the lane axis; zero-pad lanes to 128.
    w1_f = jnp.transpose(w1, (1, 0, 2)).reshape(In, H)           # (In, V*S)
    w1_f = jnp.pad(w1_f, ((0, 0), (0, H_pad - H)))
    b1_f = jnp.pad(b1.reshape(1, H), ((0, 0), (0, H_pad - H)))

    # Layer 2: block-diagonal so y[:, v*Out:(v+1)*Out] = h[:, v*S:(v+1)*S] @ w2[v].
    # O(V^2) storage with 1/V non-zero — fine at V=4 (single padded MXU tile);
    # see module-level TODO(synk) about scaling.
    eye_v = jnp.eye(V, dtype=w2.dtype)
    w2_f = jnp.einsum("vw,vso->vswo", eye_v, w2).reshape(H, O)   # (V*S, V*Out)
    w2_f = jnp.pad(w2_f, ((0, H_pad - H), (0, O_pad - O)))
    b2_f = jnp.pad(b2.reshape(1, O), ((0, 0), (0, O_pad - O)))

    return w1_f, b1_f, w2_f, b2_f, V, Out


# ------------------------------ wrapper --------------------------------------


def multivar_fsp_fused(x, w1_f, b1_f, w2_f, b2_f, V, Out, *,
                       mxu_dtype=jnp.float32):
    """x: (B, inputs), fused params from fuse_params. Returns (B, V, outputs)."""
    B, In = x.shape
    H_pad = w1_f.shape[1]
    O_pad = w2_f.shape[1]

    # Row padding to the f32 sublane (8); 256-row batch tiles once B is large.
    tm = 256 if B >= 256 else pl.cdiv(B, 8) * 8
    B_pad = pl.cdiv(B, tm) * tm
    if B_pad != B:
        x = jnp.pad(x, ((0, B_pad - B), (0, 0)))
    grid = (B_pad // tm,)

    cost = pl.CostEstimate(
        flops=2 * B_pad * In * H_pad + 2 * B_pad * H_pad * O_pad,
        transcendentals=B_pad * H_pad,
        bytes_accessed=4 * (x.size + w1_f.size + b1_f.size + w2_f.size
                            + b2_f.size + B_pad * O_pad),
    )

    out_flat = pl.pallas_call(
        functools.partial(_mfsp_kernel, mxu_dtype=mxu_dtype),
        out_shape=jax.ShapeDtypeStruct((B_pad, O_pad), jnp.float32),
        grid=grid,
        in_specs=[
            pl.BlockSpec((tm, In), lambda i: (i, 0)),       # x: tiled over B
            pl.BlockSpec((In, H_pad), lambda i: (0, 0)),    # weights resident
            pl.BlockSpec((1, H_pad), lambda i: (0, 0)),
            pl.BlockSpec((H_pad, O_pad), lambda i: (0, 0)),
            pl.BlockSpec((1, O_pad), lambda i: (0, 0)),
        ],
        out_specs=pl.BlockSpec((tm, O_pad), lambda i: (i, 0)),
        compiler_params=pltpu.CompilerParams(
            dimension_semantics=("parallel",)),
        cost_estimate=cost,
    )(x, w1_f, b1_f, w2_f, b2_f)

    # Strip row/lane padding; (B, V*Out) -> (B, V, Out) is a free view.
    return out_flat[:B, : V * Out].reshape(B, V, Out)


def multivar_fsp(x, w1, b1, w2, b2, *, mxu_dtype=jnp.float32):
    """Convenience wrapper: fuse params + run (prefer hoisting fuse_params)."""
    fused = fuse_params(w1, b1, w2, b2)
    return multivar_fsp_fused(x, *fused, mxu_dtype=mxu_dtype)


# ---------------------------- reference --------------------------------------


def multivar_fsp_ref(x, w1, b1, w2, b2):
    """Plain-JAX reference mirroring the PyTorch double loop."""
    outs = []
    for b in range(x.shape[0]):
        per_var = []
        for v in range(w1.shape[0]):
            h = jnp.tanh(x[b] @ w1[v] + b1[v, 0])
            per_var.append(h @ w2[v] + b2[v, 0])
        outs.append(jnp.stack(per_var))
    return jnp.stack(outs)


if __name__ == "__main__":
    # Small shapes consistent with the module:
    #   inputs=32, signals=16 hidden, outputs=8, variables=4 heads, batch=2.
    B, In, S, Out, V = 2, 32, 16, 8, 4

    key = jax.random.PRNGKey(0)
    kx, k1, k2, k3, k4 = jax.random.split(key, 5)

    x = jax.random.normal(kx, (B, In), dtype=jnp.float32)
    w1 = jax.random.normal(k1, (V, In, S), dtype=jnp.float32) * 0.1
    b1 = jax.random.normal(k2, (V, 1, S), dtype=jnp.float32) * 0.1
    w2 = jax.random.normal(k3, (V, S, Out), dtype=jnp.float32) * 0.1
    b2 = jax.random.normal(k4, (V, 1, Out), dtype=jnp.float32) * 0.1

    # Parameter fusion done once ("module init"), forward called with fused
    # params — no per-call rebuild of the fused/padded weights.
    fused = fuse_params(w1, b1, w2, b2)
    out = jax.block_until_ready(multivar_fsp_fused(x, *fused))
    ref = jax.block_until_ready(multivar_fsp_ref(x, w1, b1, w2, b2))

    assert out.shape == (B, V, Out), out.shape
    assert jnp.allclose(out, ref, atol=1e-5, rtol=1e-5), "mismatch vs reference"

    print("KERNEL_OK")
</pallas_src>

<mosaic_0001>
module attributes {stable_mosaic.version = 11 : i64} {
  func.func @_mfsp_kernel(%arg0: i32, %arg1: memref<8x32xf32, #tpu.memory_space<vmem>>, %arg2: memref<32x128xf32, #tpu.memory_space<vmem>>, %arg3: memref<1x128xf32, #tpu.memory_space<vmem>>, %arg4: memref<128x128xf32, #tpu.memory_space<vmem>>, %arg5: memref<1x128xf32, #tpu.memory_space<vmem>>, %arg6: memref<8x128xf32, #tpu.memory_space<vmem>>) attributes {dimension_semantics = [#tpu.dimension_semantics<parallel>], iteration_bounds = array<i64: 1>, scalar_prefetch = 0 : i64, scratch_operands = 0 : i64, tpu.core_type = #tpu.core_type<tc>, window_params = [{transform_indices = @transform_0, window_bounds = array<i64: 8, 32>}, {pipeline_mode = #tpu.pipeline_mode<synchronous>, transform_indices = @transform_1, window_bounds = array<i64: 32, 128>}, {pipeline_mode = #tpu.pipeline_mode<synchronous>, transform_indices = @transform_2, window_bounds = array<i64: 1, 128>}, {pipeline_mode = #tpu.pipeline_mode<synchronous>, transform_indices = @transform_3, window_bounds = array<i64: 128, 128>}, {pipeline_mode = #tpu.pipeline_mode<synchronous>, transform_indices = @transform_4, window_bounds = array<i64: 1, 128>}, {transform_indices = @transform_5, window_bounds = array<i64: 8, 128>}]} {
    %c0 = arith.constant 0 : index
    %c0_0 = arith.constant 0 : index
    %0 = vector.load %arg1[%c0, %c0_0] : memref<8x32xf32, #tpu.memory_space<vmem>>, vector<8x32xf32>
    %c0_1 = arith.constant 0 : index
    %c0_2 = arith.constant 0 : index
    %1 = vector.load %arg2[%c0_1, %c0_2] : memref<32x128xf32, #tpu.memory_space<vmem>>, vector<32x128xf32>
    %cst = arith.constant dense<0.000000e+00> : vector<8x128xf32>
    %2 = tpu.matmul %0, %1, %cst {dimension_numbers = #tpu.dot_dimension_numbers<[1], [0], [0], [1], [0, 0, 1, 1], [], []>} : vector<8x32xf32>, vector<32x128xf32>, vector<8x128xf32> -> vector<8x128xf32>
    %c0_3 = arith.constant 0 : index
    %c0_4 = arith.constant 0 : index
    %3 = vector.load %arg3[%c0_3, %c0_4] : memref<1x128xf32, #tpu.memory_space<vmem>>, vector<1x128xf32>
    %4 = vector.broadcast %3 : vector<1x128xf32> to vector<8x128xf32>
    %5 = arith.addf %2, %4 : vector<8x128xf32>
    %6 = math.tanh %5 : vector<8x128xf32>
    %c0_5 = arith.constant 0 : index
    %c0_6 = arith.constant 0 : index
    %7 = vector.load %arg4[%c0_5, %c0_6] : memref<128x128xf32, #tpu.memory_space<vmem>>, vector<128x128xf32>
    %cst_7 = arith.constant dense<0.000000e+00> : vector<8x128xf32>
    %8 = tpu.matmul %6, %7, %cst_7 {dimension_numbers = #tpu.dot_dimension_numbers<[1], [0], [0], [1], [0, 0, 1, 1], [], []>} : vector<8x128xf32>, vector<128x128xf32>, vector<8x128xf32> -> vector<8x128xf32>
    %c0_8 = arith.constant 0 : index
    %c0_9 = arith.constant 0 : index
    %9 = vector.load %arg5[%c0_8, %c0_9] : memref<1x128xf32, #tpu.memory_space<vmem>>, vector<1x128xf32>
    %10 = vector.broadcast %9 : vector<1x128xf32> to vector<8x128xf32>
    %11 = arith.addf %8, %10 : vector<8x128xf32>
    %c0_10 = arith.constant 0 : index
    %c0_11 = arith.constant 0 : index
    %12 = vector.load %arg6[%c0_10, %c0_11] : memref<8x128xf32, #tpu.memory_space<vmem>>, vector<8x128xf32>
    tpu.vector_store %arg6[%c0_10, %c0_11], %11 {strides = array<i32>} : memref<8x128xf32, #tpu.memory_space<vmem>>, vector<8x128xf32>,
    return
  }
  func.func @transform_0(%arg0: i32) -> (i32, i32) {
    %c0_i32 = arith.constant 0 : i32
    %c0_i32_0 = arith.constant 0 : i32
    return %arg0, %c0_i32 : i32, i32
  }
  func.func @transform_1(%arg0: i32) -> (i32, i32) {
    %c0_i32 = arith.constant 0 : i32
    %c0_i32_0 = arith.constant 0 : i32
    %c0_i32_1 = arith.constant 0 : i32
    return %c0_i32, %c0_i32_0 : i32, i32
  }
  func.func @transform_2(%arg0: i32) -> (i32, i32) {
    %c0_i32 = arith.constant 0 : i32
    %c0_i32_0 = arith.constant 0 : i32
    %c0_i32_1 = arith.constant 0 : i32
    return %c0_i32, %c0_i32_0 : i32, i32
  }
  func.func @transform_3(%arg0: i32) -> (i32, i32) {
    %c0_i32 = arith.constant 0 : i32
    %c0_i32_0 = arith.constant 0 : i32
    %c0_i32_1 = arith.constant 0 : i32
    return %c0_i32, %c0_i32_0 : i32, i32
  }
  func.func @transform_4(%arg0: i32) -> (i32, i32) {
    %c0_i32 = arith.constant 0 : i32
    %c0_i32_0 = arith.constant 0 : i32
    %c0_i32_1 = arith.constant 0 : i32
    return %c0_i32, %c0_i32_0 : i32, i32
  }
  func.func @transform_5(%arg0: i32) -> (i32, i32) {
    %c0_i32 = arith.constant 0 : i32
    %c0_i32_0 = arith.constant 0 : i32
    return %arg0, %c0_i32 : i32, i32
  }
}

</mosaic_0001>

<bundles_post_ra>
// kernel: tpu_custom_call.1
= control target key start
LH: loop header
LB: loop body
LE: loop exit
PB: predicated region body
PF: predicated region fallthrough
CT: control target
= control target key end

     0   :  { %10 = vsyncpa [#allocation3], 0  ;;  %s562_s0 = inlined_call_operand.hbm [shape: f32[8,32], index: 0, kind: input, shape index: {}]   ;;  %s563_s1 = inlined_call_operand.hbm [shape: f32[32,128], index: 1, kind: input, shape index: {}]   ;;  %s564_s2 = inlined_call_operand.vmem [shape: f32[1,128], index: 2, kind: input, shape index: {}]   ;;  %s565_s3 = inlined_call_operand.hbm [shape: f32[128,128], index: 3, kind: input, shape index: {}]   ;;  %s566_s4 = inlined_call_operand.vmem [shape: f32[1,128], index: 4, kind: input, shape index: {}]   ;;  %s567_s5 = inlined_call_operand.hbm [shape: f32[8,128], index: 5, kind: output, shape index: {}]  }
   0x1   :  { %11 = vsyncpa [#allocation6], 0 }
   0x2   :  { %12 = vsyncpa [#allocation4], 0  ;;  %s463_s18 = smov [#allocation5]   ;;  %s369_s22 = scalar_lea.hbm %s563_s1, 512 }
   0x3   :  { %s28_s19 = sshll.u32 %s463_s18, 4  ;;  %p370_p0 = scmp.ne.s32.totalorder %s563_s1, %s369_s22  ;;  %s29_s19 = int_to_ptr.vmem [resolvable:$true] %s28_s19 }
   0x4   :  { %p373_p1 = scmp.lt.u32.totalorder %s369_s22, %s563_s1 }
   0x6   :  { %p375_p2 = pnand %p373_p1, %p370_p0 }
   0x8   :  { %378 = shalt.err (!%p375_p2)
}
   0x9   :  { %s379_s27 = scalar_lea.vmem %s29_s19, 512  ;;  %p384_p4 = scmp.lt.s32.totalorder %s29_s19, %s29_s19 }
   0xa   :  { %p380_p3 = scmp.ne.s32.totalorder %s29_s19, %s379_s27  ;;  %p385_p5 = scmp.lt.s32.totalorder %s379_s27, %s379_s27 }
   0xc   :  { %p386_p6 = por %p385_p5, %p384_p4 }
   0xe   :  { %p387_p7 = pnand %p386_p6, %p380_p3 }
  0x10   :  { %390 = shalt.err (!%p387_p7)
}
  0x11   :  { %s464_s28 = smov 128   ;;  %s465_s29 = smov 8  }
  0x12   :  { %34 = dma.hbm_to_vmem [thread:$0]  %s563_s1, 512, %s29_s19, [#allocation6], %s464_s28, %s464_s28, %s465_s29  }
  0x13   :  { %s466_s7 = smov [#allocation2]   ;;  %s467_s9 = smov [#allocation7]  }
  0x14   :  { %s19_s8 = sshll.u32 %s466_s7, 4  ;;  %s42_s10 = sshll.u32 %s467_s9, 4  ;;  %s20_s8 = int_to_ptr.vmem [resolvable:$true] %s19_s8  ;;  %s43_s10 = int_to_ptr.vmem [resolvable:$true] %s42_s10 }
  0x15   :  { %s391_s13 = scalar_lea.hbm %s562_s0, 128 }
  0x16   :  { %p392_p8 = scmp.ne.s32.totalorder %s562_s0, %s391_s13  ;;  %p395_p9 = scmp.lt.u32.totalorder %s391_s13, %s562_s0 }
  0x18   :  { %p397_p10 = pnand %p395_p9, %p392_p8 }
  0x1a   :  { %400 = shalt.err (!%p397_p10)
}
  0x1b   :  { %s401_s1 = scalar_lea.vmem %s20_s8, 128  ;;  %p406_p12 = scmp.lt.s32.totalorder %s20_s8, %s20_s8 }
  0x1c   :  { %p402_p11 = scmp.ne.s32.totalorder %s20_s8, %s401_s1  ;;  %p407_p13 = scmp.lt.s32.totalorder %s401_s1, %s401_s1 }
  0x1e   :  { %p408_p0 = por %p407_p13, %p406_p12 }
  0x20   :  { %p409_p1 = pnand %p408_p0, %p402_p11 }
  0x22   :  { %412 = shalt.err (!%p409_p1)
}
  0x23   :  { %22 = dma.hbm_to_vmem [thread:$0]  %s562_s0, 128, %s20_s8, [#allocation3]  }
  0x24   :  { %s413_s22 = scalar_lea.hbm %s565_s3, 2048 }
  0x25   :  { %p414_p2 = scmp.ne.s32.totalorder %s565_s3, %s413_s22  ;;  %p417_p3 = scmp.lt.u32.totalorder %s413_s22, %s565_s3 }
  0x27   :  { %p419_p4 = pnand %p417_p3, %p414_p2 }
  0x29   :  { %422 = shalt.err (!%p419_p4)
}
  0x2a   :  { %s423_s27 = scalar_lea.vmem %s43_s10, 2048  ;;  %p428_p6 = scmp.lt.s32.totalorder %s43_s10, %s43_s10 }
  0x2b   :  { %p424_p5 = scmp.ne.s32.totalorder %s43_s10, %s423_s27  ;;  %p429_p7 = scmp.lt.s32.totalorder %s423_s27, %s423_s27 }
  0x2d   :  { %p430_p8 = por %p429_p7, %p428_p6 }
  0x2f   :  { %p431_p9 = pnand %p430_p8, %p424_p5 }
  0x31   :  { %434 = shalt.err (!%p431_p9)
}
  0x32   :  { %48 = dma.hbm_to_vmem [thread:$0]  %s565_s3, 2048, %s43_s10, [#allocation6], %s464_s28, %s464_s28, %s465_s29  }
  0x33   :  { %457 = dma.done.wait [#allocation3], 128  }
  0x34   :  { %458 = vsyncadd [#allocation3], 4294967168 }
  0x35   :  { %459 = dma.done.wait [#allocation6], 2560  }
  0x36   :  { %460 = vsyncadd [#allocation6], 4294964736  ;;  %v468_v0 = vmov 0.0|0.0   ;;  %vm469_vm0 = vmmov 0   ;;  %v470_v1 = vmov 0.0   ;;  %v61_v2 = vld [vmem:[#allocation5] sm:$0xff] }
  0x37   :  { %328 = vmatprep.subr.bf16.mxu0 %v468_v0  ;;  %290 = vmatprep.mubr.msk.f32.mxu0 %vm469_vm0, %v470_v1  ;;  %v62_v3 = vld [vmem:[#allocation5 + $0x8] sm:$0xff]  ;;  %v63_v4 = vld [vmem:[#allocation5 + $0x10] sm:$0xff]  ;;  %v64_v6 = vld [vmem:[#allocation5 + $0x18] sm:$0xff]  ;;  %vm72_vm1 = vcmask 261120   ;;  %s471_s7 = smov [#allocation8]  }
  0x38   :  { %334 = vmatprep.subr.bf16.mxu1 %v468_v0  ;;  %325 = vmatprep.mubr.msk.f32.mxu1 %vm469_vm0, %v470_v1  ;;  %v329_v5 = vpack.c.bf16 %v62_v3, %v61_v2  ;;  %v147_v7 = vld [vmem:[#allocation7] sm:$0xff]  ;;  %v148_v8 = vld [vmem:[#allocation7 + $0x8] sm:$0xff]  ;;  %v149_v9 = vld [vmem:[#allocation7 + $0x10] sm:$0xff]  ;;  %v332_v11 = vpack.c.bf16 %v64_v6, %v63_v4  ;;  %s247_s8 = sshll.u32 %s471_s7, 4  ;;  %s248_s8 = int_to_ptr.vmem [resolvable:$true] %s247_s8 }
  0x39   :  { %v150_v10 = vld [vmem:[#allocation7 + $0x18] sm:$0xff]  ;;  %v335_v12 = vpack.c.bf16 %v148_v8, %v147_v7  ;;  %v151_v14 = vld [vmem:[#allocation7 + $0x20] sm:$0xff]  ;;  %v152_v15 = vld [vmem:[#allocation7 + $0x28] sm:$0xff]  ;;  %s435_s9 = scalar_lea.vmem %s248_s8, 128  ;;  %p440_p11 = scmp.lt.s32.totalorder %s248_s8, %s248_s8 }
  0x3a   :  { %330 = vmatpush3.bf16.msra.mxu0 %v329_v5  ;;  %v338_v13 = vpack.c.bf16 %v150_v10, %v149_v9  ;;  %v60_v16 = vld [vmem:[#allocation2] sm:$0xff]  ;;  %v341_v17 = vpack.c.bf16 %v152_v15, %v151_v14  ;;  %v153_v18 = vld [vmem:[#allocation7 + $0x30] sm:$0xff]  ;;  %v155_v21 = vld [vmem:[#allocation7 + $0x40] sm:$0xff]  ;;  %p436_p10 = scmp.ne.s32.totalorder %s248_s8, %s435_s9  ;;  %p441_p12 = scmp.lt.s32.totalorder %s435_s9, %s435_s9 }
  0x3b   :  { %331 = vmatprep.subr.bf16.mxu0 %v468_v0  ;;  %336 = vmatpush3.bf16.msra.mxu1 %v335_v12  ;;  %v154_v19 = vld [vmem:[#allocation7 + $0x38] sm:$0xff]  ;;  %v156_v22 = vld [vmem:[#allocation7 + $0x48] sm:$0xff]  ;;  %v157_v24 = vld [vmem:[#allocation7 + $0x50] sm:$0xff] }
  0x3c   :  { %337 = vmatprep.subr.bf16.mxu1 %v468_v0  ;;  %v344_v20 = vpack.c.bf16 %v154_v19, %v153_v18  ;;  %v347_v23 = vpack.c.bf16 %v156_v22, %v155_v21  ;;  %v158_v25 = vld [vmem:[#allocation7 + $0x58] sm:$0xff]  ;;  %v159_v27 = vld [vmem:[#allocation7 + $0x60] sm:$0xff]  ;;  %v160_v28 = vld [vmem:[#allocation7 + $0x68] sm:$0xff]  ;;  %p442_p13 = por %p441_p12, %p440_p11 }
  0x3d   :  { %v350_v26 = vpack.c.bf16 %v158_v25, %v157_v24  ;;  %v353_v29 = vpack.c.bf16 %v160_v28, %v159_v27  ;;  %v161_v30 = vld [vmem:[#allocation7 + $0x70] sm:$0xff]  ;;  %v162_v31 = vld [vmem:[#allocation7 + $0x78] sm:$0xff] }
  0x3e   :  { %333 = vmatpush3.bf16.msra.mxu0 %v332_v11  ;;  %v356_v32 = vpack.c.bf16 %v162_v31, %v161_v30  ;;  %v257_v33 = vld [vmem:[%s564_s2] ss:$0 sm:$0xff]  ;;  %p443_p0 = pnand %p442_p13, %p436_p10 }
  0x3f   :  { %339 = vmatpush3.bf16.msra.mxu1 %v338_v13  ;;  %v259_v38 = vld [vmem:[%s566_s4] ss:$0 sm:$0xff] }
  0x40   :  { %340 = vmatprep.subr.bf16.mxu1 %v468_v0 }
  0x41   :  { %291 = vmatmul.mubr.msk.f32.vlgmr.msra.gmra.mrb[0].mxu0 %vm72_vm1, %v60_v16 }
  0x43   :  { %342 = vmatpush3.bf16.msra.mxu1 %v341_v17 }
  0x44   :  { %343 = vmatprep.subr.bf16.mxu1 %v468_v0 }
  0x47   :  { %345 = vmatpush3.bf16.msra.mxu1 %v344_v20 }
  0x48   :  { %346 = vmatprep.subr.bf16.mxu1 %v468_v0 }
  0x4b   :  { %348 = vmatpush3.bf16.msra.mxu1 %v347_v23 }
  0x4c   :  { %349 = vmatprep.subr.bf16.mxu1 %v468_v0 }
  0x4f   :  { %351 = vmatpush3.bf16.msra.mxu1 %v350_v26 }
  0x50   :  { %352 = vmatprep.subr.bf16.mxu1 %v468_v0 }
  0x53   :  { %354 = vmatpush3.bf16.msra.mxu1 %v353_v29 }
  0x54   :  { %355 = vmatprep.subr.bf16.mxu1 %v468_v0 }
  0x57   :  { %357 = vmatpush3.bf16.msra.mxu1 %v356_v32 }
 0x114   :  { %v142_v34 = vpop.f32.mrb[0].mxu0 }
 0x115   :  { %v143_v35 = vadd.f32 %v257_v33, %v142_v34  ;;  %v292_v36 = vpop.f32.mrb[1].mxu0 }
 0x117   :  { %367 = vtanh.f32 %v143_v35 }
 0x121   :  { %v368_v37 = vpop.eup %367 }
 0x122   :  { %326 = vmatmul.mubr.f32.vlgmr.msra.gmra.mrb[0].mxu1 %v368_v37 }
 0x1f5   :  { %v236_v39 = vpop.f32.mrb[0].mxu1 }
 0x1f6   :  { %v237_v40 = vadd.f32 %v259_v38, %v236_v39  ;;  %v327_v41 = vpop.f32.mrb[1].mxu1 }
 0x1f8   :  { %240 = vst [vmem:[#allocation8] sm:$0xff] %v237_v40 }
 0x1f9   :  { %446 = shalt.err (!%p443_p0)
}
 0x1fa   :  { %s447_s11 = scalar_lea.hbm %s567_s5, 128 }
 0x1fb   :  { %p448_p1 = scmp.ne.s32.totalorder %s567_s5, %s447_s11  ;;  %p451_p2 = scmp.lt.u32.totalorder %s447_s11, %s567_s5 }
 0x1fd   :  { %p453_p3 = pnand %p451_p2, %p448_p1 }
 0x1ff   :  { %456 = shalt.err (!%p453_p3)
}
 0x200   :  { %250 = dma.vmem_to_hbm [thread:$0]  %s248_s8, 128, %s567_s5, [#allocation4]  }
 0x201   :  { %461 = dma.done.wait [#allocation4], 128  }
 0x202   :  { %462 = vsyncadd [#allocation4], 4294967168 }
 0x203   :  { %254 = vsyncpa [#allocation3], 1 }
 0x204   :  { %255 = vsyncpa [#allocation6], 1 }
 0x205   :  { %256 = vsyncpa [#allocation4], 1 }

</bundles_post_ra>
